<compile_context>
chip_gen: v6e
topology: v6e:2x2x1
jax: 0.10.0
libtpu: 0.0.40
codegen_flags: <defaults>
</compile_context>

<pallas_src>
import jax
import jax.numpy as jnp
from jax.experimental import pallas as pl
from jax.experimental.pallas import tpu as pltpu


def _round_up(x: int, m: int) -> int:
    return (x + m - 1) // m * m


def _cdiv(a: int, b: int) -> int:
    return (a + b - 1) // b


_MAX_TILE_V = 32768                    # lane-axis tile cap (multiple of 128)
_MAX_TILE_B = 1024                     # sublane-axis tile cap (multiple of 8)
_TARGET_BLOCK_BYTES = 2 * 1024 * 1024  # ~2 MiB f32 per input block


def _pick_tiles(B: int, V: int):
    """Lane/sublane-aligned, VMEM-budgeted tiles with minimal zero padding."""
    # Vocab (lane) axis: fewest tiles that fit under the cap, each rounded to 128.
    v128 = _round_up(V, 128)
    nv = _cdiv(v128, _MAX_TILE_V)
    tile_v = _round_up(_cdiv(v128, nv), 128)
    # Batch (sublane) axis: budget rows so one input block is ~2 MiB.
    rows = max(8, min(_MAX_TILE_B, (_TARGET_BLOCK_BYTES // (tile_v * 4)) // 8 * 8))
    b8 = _round_up(B, 8)
    nb = _cdiv(b8, rows)
    tile_b = _round_up(_cdiv(b8, nb), 8)
    return tile_b, tile_v, nb, nv


def _make_rkl_kernel(tile_b: int, tile_v: int):
    n_slabs = tile_b // 8        # sublane groups per block
    n_chunks = tile_v // 128     # lane groups per block
    n_blocks = n_slabs * n_chunks
    nacc = min(8, n_blocks)      # rotating accumulators -> short dep chains

    def rkl_kernel(logp_ref, logq_ref, out_ref, acc_ref):
        j = pl.program_id(1)

        @pl.when(j == 0)
        def _():
            acc_ref[...] = jnp.zeros_like(acc_ref)

        # Hot loop: one (8,128) vreg of each operand per step, accumulate
        # exp(log_p) * (log_p - log_q) into register-resident accumulators.
        accs = [jnp.zeros((8, 128), jnp.float32) for _ in range(nacc)]
        idx = 0
        for s in range(n_slabs):                       # static, tile-aligned slices
            r0, r1 = s * 8, (s + 1) * 8
            for c in range(n_chunks):
                c0, c1 = c * 128, (c + 1) * 128
                lp = logp_ref[r0:r1, c0:c1].astype(jnp.float32)
                lq = logq_ref[r0:r1, c0:c1].astype(jnp.float32)
                accs[idx % nacc] = accs[idx % nacc] + jnp.exp(lp) * (lp - lq)
                idx += 1

        total = accs[0]
        for a in accs[1:]:
            total = total + a
        acc_ref[...] += total

        # Finalize once per batch tile (last vocab step): lane-dense (8,128)
        # unmasked store of this tile's partial sum.
        @pl.when(j == pl.num_programs(1) - 1)
        def _():
            out_ref[...] = acc_ref[...]

    return rkl_kernel


def reverse_kl(log_p: jax.Array, log_q: jax.Array) -> jax.Array:
    """F.kl_div(log_q, log_p, reduction='batchmean', log_target=True) on TPU."""
    assert log_p.shape == log_q.shape and log_p.ndim == 2
    B, V = log_p.shape

    tile_b, tile_v, nb, nv = _pick_tiles(B, V)
    Bp, Vp = nb * tile_b, nv * tile_v
    if (Bp, Vp) != (B, V):
        # Zero padding contributes exactly 0: exp(0) * (0 - 0) == 0.
        pad = ((0, Bp - B), (0, Vp - V))
        log_p = jnp.pad(log_p, pad)
        log_q = jnp.pad(log_q, pad)

    partials = pl.pallas_call(
        _make_rkl_kernel(tile_b, tile_v),
        out_shape=jax.ShapeDtypeStruct((nb * 8, 128), jnp.float32),
        grid_spec=pltpu.PrefetchScalarGridSpec(
            num_scalar_prefetch=0,
            grid=(nb, nv),  # batch outer ("parallel"), vocab inner (reduction)
            in_specs=[
                pl.BlockSpec((tile_b, tile_v), lambda i, j: (i, j)),
                pl.BlockSpec((tile_b, tile_v), lambda i, j: (i, j)),
            ],
            out_specs=pl.BlockSpec((8, 128), lambda i, j: (i, 0)),
            scratch_shapes=[pltpu.VMEM((8, 128), jnp.float32)],
        ),
        compiler_params=pltpu.CompilerParams(
            dimension_semantics=("parallel", "arbitrary"),
            vmem_limit_bytes=32 * 1024 * 1024,
        ),
    )(log_p, log_q)

    # Tiny final fold of the lane-dense per-tile partials + batchmean scale.
    return jnp.sum(partials) / B


if __name__ == "__main__":
    key = jax.random.PRNGKey(0)
    kp, kq = jax.random.split(key)

    B, V = 16, 256  # small synthetic shapes: batch=16, vocab=256
    log_p = jax.nn.log_softmax(jax.random.normal(kp, (B, V), dtype=jnp.float32), axis=-1)
    log_q = jax.nn.log_softmax(jax.random.normal(kq, (B, V), dtype=jnp.float32), axis=-1)

    out = jax.block_until_ready(reverse_kl(log_p, log_q))

    # Pure-JAX reference (same semantics as torch F.kl_div with log_target=True,
    # reduction='batchmean').
    ref = jnp.sum(jnp.exp(log_p) * (log_p - log_q)) / B
    assert jnp.allclose(out, ref, rtol=1e-5, atol=1e-6), (out, ref)

    print("KERNEL_OK")
</pallas_src>

<mosaic_0001>
module attributes {stable_mosaic.version = 11 : i64} {
  func.func @rkl_kernel(%arg0: i32, %arg1: i32, %arg2: memref<16x256xf32, #tpu.memory_space<vmem>>, %arg3: memref<16x256xf32, #tpu.memory_space<vmem>>, %arg4: memref<8x128xf32, #tpu.memory_space<vmem>>, %arg5: memref<8x128xf32, #tpu.memory_space<vmem>>) attributes {dimension_semantics = [#tpu.dimension_semantics<parallel>, #tpu.dimension_semantics<arbitrary>], iteration_bounds = array<i64: 1, 1>, scalar_prefetch = 0 : i64, scratch_operands = 1 : i64, tpu.core_type = #tpu.core_type<tc>, window_params = [{transform_indices = @transform_0, window_bounds = array<i64: 16, 256>}, {transform_indices = @transform_1, window_bounds = array<i64: 16, 256>}, {transform_indices = @transform_2, window_bounds = array<i64: 8, 128>}]} {
    %c0_i32 = arith.constant 0 : i32
    %0 = arith.cmpi eq, %arg1, %c0_i32 : i32
    %1 = arith.extui %0 : i1 to i32
    %c0_i32_0 = arith.constant 0 : i32
    %2 = arith.cmpi ne, %1, %c0_i32_0 : i32
    scf.if %2 {
      %cst_23 = arith.constant 0.000000e+00 : f32
      %40 = vector.broadcast %cst_23 : f32 to vector<8x128xf32>
      %c0_24 = arith.constant 0 : index
      %c0_25 = arith.constant 0 : index
      %41 = vector.load %arg5[%c0_24, %c0_25] : memref<8x128xf32, #tpu.memory_space<vmem>>, vector<8x128xf32>
      tpu.vector_store %arg5[%c0_24, %c0_25], %40 {strides = array<i32>} : memref<8x128xf32, #tpu.memory_space<vmem>>, vector<8x128xf32>,
    } else {
    }
    %cst = arith.constant 0.000000e+00 : f32
    %3 = vector.broadcast %cst : f32 to vector<8x128xf32>
    %cst_1 = arith.constant 0.000000e+00 : f32
    %4 = vector.broadcast %cst_1 : f32 to vector<8x128xf32>
    %cst_2 = arith.constant 0.000000e+00 : f32
    %5 = vector.broadcast %cst_2 : f32 to vector<8x128xf32>
    %cst_3 = arith.constant 0.000000e+00 : f32
    %6 = vector.broadcast %cst_3 : f32 to vector<8x128xf32>
    %c0 = arith.constant 0 : index
    %c0_4 = arith.constant 0 : index
    %7 = vector.load %arg2[%c0, %c0_4] : memref<16x256xf32, #tpu.memory_space<vmem>>, vector<8x128xf32>
    %c0_5 = arith.constant 0 : index
    %c0_6 = arith.constant 0 : index
    %8 = vector.load %arg3[%c0_5, %c0_6] : memref<16x256xf32, #tpu.memory_space<vmem>>, vector<8x128xf32>
    %9 = math.exp %7 : vector<8x128xf32>
    %10 = arith.subf %7, %8 : vector<8x128xf32>
    %11 = arith.mulf %9, %10 : vector<8x128xf32>
    %12 = arith.addf %3, %11 : vector<8x128xf32>
    %c0_7 = arith.constant 0 : index
    %c128 = arith.constant 128 : index
    %13 = vector.load %arg2[%c0_7, %c128] : memref<16x256xf32, #tpu.memory_space<vmem>>, vector<8x128xf32>
    %c0_8 = arith.constant 0 : index
    %c128_9 = arith.constant 128 : index
    %14 = vector.load %arg3[%c0_8, %c128_9] : memref<16x256xf32, #tpu.memory_space<vmem>>, vector<8x128xf32>
    %15 = math.exp %13 : vector<8x128xf32>
    %16 = arith.subf %13, %14 : vector<8x128xf32>
    %17 = arith.mulf %15, %16 : vector<8x128xf32>
    %18 = arith.addf %4, %17 : vector<8x128xf32>
    %c8 = arith.constant 8 : index
    %c0_10 = arith.constant 0 : index
    %19 = vector.load %arg2[%c8, %c0_10] : memref<16x256xf32, #tpu.memory_space<vmem>>, vector<8x128xf32>
    %c8_11 = arith.constant 8 : index
    %c0_12 = arith.constant 0 : index
    %20 = vector.load %arg3[%c8_11, %c0_12] : memref<16x256xf32, #tpu.memory_space<vmem>>, vector<8x128xf32>
    %21 = math.exp %19 : vector<8x128xf32>
    %22 = arith.subf %19, %20 : vector<8x128xf32>
    %23 = arith.mulf %21, %22 : vector<8x128xf32>
    %24 = arith.addf %5, %23 : vector<8x128xf32>
    %c8_13 = arith.constant 8 : index
    %c128_14 = arith.constant 128 : index
    %25 = vector.load %arg2[%c8_13, %c128_14] : memref<16x256xf32, #tpu.memory_space<vmem>>, vector<8x128xf32>
    %c8_15 = arith.constant 8 : index
    %c128_16 = arith.constant 128 : index
    %26 = vector.load %arg3[%c8_15, %c128_16] : memref<16x256xf32, #tpu.memory_space<vmem>>, vector<8x128xf32>
    %27 = math.exp %25 : vector<8x128xf32>
    %28 = arith.subf %25, %26 : vector<8x128xf32>
    %29 = arith.mulf %27, %28 : vector<8x128xf32>
    %30 = arith.addf %6, %29 : vector<8x128xf32>
    %31 = arith.addf %12, %18 : vector<8x128xf32>
    %32 = arith.addf %31, %24 : vector<8x128xf32>
    %33 = arith.addf %32, %30 : vector<8x128xf32>
    %c0_17 = arith.constant 0 : index
    %c0_18 = arith.constant 0 : index
    %34 = vector.load %arg5[%c0_17, %c0_18] : memref<8x128xf32, #tpu.memory_space<vmem>>, vector<8x128xf32>
    %35 = arith.addf %34, %33 : vector<8x128xf32>
    %c0_19 = arith.constant 0 : index
    %c0_20 = arith.constant 0 : index
    %36 = vector.load %arg5[%c0_19, %c0_20] : memref<8x128xf32, #tpu.memory_space<vmem>>, vector<8x128xf32>
    tpu.vector_store %arg5[%c0_19, %c0_20], %35 {strides = array<i32>} : memref<8x128xf32, #tpu.memory_space<vmem>>, vector<8x128xf32>,
    %c0_i32_21 = arith.constant 0 : i32
    %37 = arith.cmpi eq, %arg1, %c0_i32_21 : i32
    %38 = arith.extui %37 : i1 to i32
    %c0_i32_22 = arith.constant 0 : i32
    %39 = arith.cmpi ne, %38, %c0_i32_22 : i32
    scf.if %39 {
      %c0_23 = arith.constant 0 : index
      %c0_24 = arith.constant 0 : index
      %40 = vector.load %arg5[%c0_23, %c0_24] : memref<8x128xf32, #tpu.memory_space<vmem>>, vector<8x128xf32>
      %c0_25 = arith.constant 0 : index
      %c0_26 = arith.constant 0 : index
      %41 = vector.load %arg4[%c0_25, %c0_26] : memref<8x128xf32, #tpu.memory_space<vmem>>, vector<8x128xf32>
      tpu.vector_store %arg4[%c0_25, %c0_26], %40 {strides = array<i32>} : memref<8x128xf32, #tpu.memory_space<vmem>>, vector<8x128xf32>,
    } else {
    }
    return
  }
  func.func @transform_0(%arg0: i32, %arg1: i32) -> (i32, i32) {
    %c0_i32 = arith.constant 0 : i32
    return %arg0, %arg1 : i32, i32
  }
  func.func @transform_1(%arg0: i32, %arg1: i32) -> (i32, i32) {
    %c0_i32 = arith.constant 0 : i32
    return %arg0, %arg1 : i32, i32
  }
  func.func @transform_2(%arg0: i32, %arg1: i32) -> (i32, i32) {
    %c0_i32 = arith.constant 0 : i32
    %c0_i32_0 = arith.constant 0 : i32
    return %arg0, %c0_i32 : i32, i32
  }
}

</mosaic_0001>

<bundles_post_ra>
// kernel: tpu_custom_call.1
= control target key start
LH: loop header
LB: loop body
LE: loop exit
PB: predicated region body
PF: predicated region fallthrough
CT: control target
= control target key end

     0   :  { %7 = vsyncpa [#allocation4], 0  ;;  %s208_s0 = inlined_call_operand.hbm [shape: f32[16,256], index: 0, kind: input, shape index: {}]   ;;  %s209_s1 = inlined_call_operand.hbm [shape: f32[16,256], index: 1, kind: input, shape index: {}]   ;;  %s210_s2 = inlined_call_operand.hbm [shape: f32[8,128], index: 2, kind: output, shape index: {}]  }
   0x1   :  { %8 = vsyncpa [#allocation7], 0 }
   0x2   :  { %9 = vsyncpa [#allocation5], 0  ;;  %s179_s9 = smov [#allocation3]  }
   0x3   :  { %s15_s10 = sshll.u32 %s179_s9, 4  ;;  %s16_s10 = int_to_ptr.vmem [resolvable:$true] %s15_s10 }
   0x4   :  { %s121_s11 = scalar_lea.vmem %s16_s10, 512  ;;  %p126_p1 = scmp.lt.s32.totalorder %s16_s10, %s16_s10 }
   0x5   :  { %p122_p0 = scmp.ne.s32.totalorder %s16_s10, %s121_s11  ;;  %p127_p2 = scmp.lt.s32.totalorder %s121_s11, %s121_s11 }
   0x7   :  { %p128_p3 = por %p127_p2, %p126_p1 }
   0x9   :  { %p129_p4 = pnand %p128_p3, %p122_p0 }
   0xb   :  { %132 = shalt.err (!%p129_p4)
}
   0xc   :  { %s180_s12 = smov 256   ;;  %s181_s13 = smov 16  }
   0xd   :  { %21 = dma.hbm_to_vmem [thread:$0]  %s208_s0, 512, %s16_s10, [#allocation4], %s180_s12, %s180_s12, %s181_s13  }
   0xe   :  { %s182_s16 = smov [#allocation6]  }
   0xf   :  { %s27_s17 = sshll.u32 %s182_s16, 4  ;;  %s28_s17 = int_to_ptr.vmem [resolvable:$true] %s27_s17 }
  0x10   :  { %s141_s18 = scalar_lea.vmem %s28_s17, 512  ;;  %p146_p6 = scmp.lt.s32.totalorder %s28_s17, %s28_s17 }
  0x11   :  { %p142_p5 = scmp.ne.s32.totalorder %s28_s17, %s141_s18  ;;  %p147_p7 = scmp.lt.s32.totalorder %s141_s18, %s141_s18 }
  0x13   :  { %p148_p8 = por %p147_p7, %p146_p6 }
  0x15   :  { %p149_p9 = pnand %p148_p8, %p142_p5 }
  0x17   :  { %152 = shalt.err (!%p149_p9)
}
  0x18   :  { %33 = dma.hbm_to_vmem [thread:$0]  %s209_s1, 512, %s28_s17, [#allocation7], %s180_s12, %s180_s12, %s181_s13  }
  0x19   :  { %173 = dma.done.wait [#allocation4], 512  }
  0x1a   :  { %174 = vsyncadd [#allocation4], 4294966784 }
  0x1b   :  { %175 = dma.done.wait [#allocation7], 512  }
  0x1c   :  { %176 = vsyncadd [#allocation7], 4294966784  ;;  %v45_v0 = vld [vmem:[#allocation3] sm:$0xff]  ;;  %v52_v1 = vld [vmem:[#allocation3 + $0x8] sm:$0xff]  ;;  %s183_s0 = smov [#allocation8]  }
  0x1d   :  { %v47_v2 = vmul.f32 1.442695, %v45_v0  ;;  %v54_v3 = vmul.f32 1.442695, %v52_v1  ;;  %v59_v4 = vld [vmem:[#allocation3 + $0x10] sm:$0xff]  ;;  %v66_v6 = vld [vmem:[#allocation3 + $0x18] sm:$0xff] }
  0x1e   :  { %v61_v5 = vmul.f32 1.442695, %v59_v4  ;;  %v68_v7 = vmul.f32 1.442695, %v66_v6  ;;  %v46_v8 = vld [vmem:[#allocation6] sm:$0xff]  ;;  %v53_v9 = vld [vmem:[#allocation6 + $0x8] sm:$0xff] }
  0x1f   :  { %105 = vpow2.f32 %v47_v2  ;;  %v60_v10 = vld [vmem:[#allocation6 + $0x10] sm:$0xff]  ;;  %v49_v11 = vsub.f32 %v45_v0, %v46_v8  ;;  %v67_v12 = vld [vmem:[#allocation6 + $0x18] sm:$0xff]  ;;  %v56_v13 = vsub.f32 %v52_v1, %v53_v9  ;;  %s90_s1 = sshll.u32 %s183_s0, 4  ;;  %s91_s1 = int_to_ptr.vmem [resolvable:$true] %s90_s1 }
  0x20   :  { %107 = vpow2.f32 %v54_v3  ;;  %v63_v14 = vsub.f32 %v59_v4, %v60_v10  ;;  %v70_v16 = vsub.f32 %v66_v6, %v67_v12  ;;  %s153_s21 = scalar_lea.vmem %s91_s1, 128  ;;  %p158_p11 = scmp.lt.s32.totalorder %s91_s1, %s91_s1 }
  0x21   :  { %109 = vpow2.f32 %v61_v5  ;;  %p154_p10 = scmp.ne.s32.totalorder %s91_s1, %s153_s21  ;;  %p159_p12 = scmp.lt.s32.totalorder %s153_s21, %s153_s21 }
  0x22   :  { %111 = vpow2.f32 %v68_v7 }
  0x23   :  { %p160_p13 = por %p159_p12, %p158_p11 }
  0x25   :  { %p161_p0 = pnand %p160_p13, %p154_p10 }
  0x2c   :  { %v106_v15 = vpop.eup %105 }
  0x2d   :  { %v108_v17 = vpop.eup %107  ;;  %v50_v18 = vmul.f32 %v106_v15, %v49_v11 }
  0x2e   :  { %v110_v19 = vpop.eup %109  ;;  %v57_v20 = vmul.f32 %v108_v17, %v56_v13 }
  0x2f   :  { %v112_v21 = vpop.eup %111  ;;  %v64_v22 = vmul.f32 %v110_v19, %v63_v14 }
  0x30   :  { %v71_v23 = vmul.f32 %v112_v21, %v70_v16  ;;  %v73_v24 = vadd.f32 %v57_v20, %v50_v18 }
  0x32   :  { %v74_v25 = vadd.f32 %v73_v24, %v64_v22 }
  0x34   :  { %v75_v26 = vadd.f32 %v74_v25, %v71_v23 }
  0x36   :  { %83 = vst [vmem:[#allocation8] sm:$0xff] %v75_v26 }
  0x37   :  { %164 = shalt.err (!%p161_p0)
}
  0x38   :  { %93 = dma.vmem_to_hbm [thread:$0]  %s91_s1, 128, %s210_s2, [#allocation5]  }
  0x39   :  { %177 = dma.done.wait [#allocation5], 128  }
  0x3a   :  { %178 = vsyncadd [#allocation5], 4294967168 }
  0x3b   :  { %97 = vsyncpa [#allocation4], 1 }
  0x3c   :  { %98 = vsyncpa [#allocation7], 1 }
  0x3d   :  { %99 = vsyncpa [#allocation5], 1 }

</bundles_post_ra>
